<compile_context>
chip_gen: v7x
topology: tpu7x:2x2x1
jax: 0.10.0
libtpu: 0.0.40
codegen_flags: <defaults>
</compile_context>

<pallas_src>
import jax
import jax.numpy as jnp
from jax.experimental import pallas as pl
from jax.experimental.pallas import tpu as pltpu

EPS = 1e-6  # matches the module's self.eps (NOT torch.nn.BatchNorm1d's 1e-5)


def batchnorm_kernel(x_ref, gamma_ref, beta_ref, o_ref):
    # x_ref: [N, TC] channel strip with the full batch resident in VMEM.
    x = x_ref[...]                                          # native dtype
    x32 = x.astype(jnp.float32)                             # f32 for stats
    n = x32.shape[0]

    # Per-channel batch statistics (reduction along the sublane/batch axis).
    mean = jnp.mean(x32, axis=0, keepdims=True)             # [1, TC]
    diff = x32 - mean                                       # [N, TC]
    # torch.var default is unbiased (N-1 denominator). N must be >= 2.
    var = jnp.sum(diff * diff, axis=0, keepdims=True) / (n - 1)   # [1, TC]
    inv_std = jax.lax.rsqrt(var + EPS)                      # [1, TC] (EUP)

    # Fold gamma/beta into one scale/shift -> per element: one mul + one add.
    gamma = gamma_ref[...]                                  # [1, TC] f32
    beta = beta_ref[...]                                    # [1, TC] f32
    scale = gamma * inv_std                                 # [1, TC]
    shift = beta - mean * scale                             # [1, TC]

    if x.dtype == jnp.float32:
        # f32 inputs: compute directly in f32 (x32 aliases x, no extra copy).
        o_ref[...] = (x32 * scale + shift).astype(o_ref.dtype)
    else:
        # bf16/narrow inputs: keep the elementwise mul-add in native dtype so
        # no full-size f32 result tile is materialized (v6e/v7x bf16 VPU).
        o_ref[...] = (x * scale.astype(x.dtype)
                      + shift.astype(x.dtype)).astype(o_ref.dtype)


def _vmem_sizing():
    """Per-generation scoped-VMEM limit and tile budget."""
    try:
        cap = int(pltpu.get_tpu_info().vmem_capacity_bytes)
    except Exception:
        cap = 64 << 20  # conservative default (v7x per-TC VMEM)
    # ~3/4 of physical VMEM, capped at 96 MiB: 96 MiB on v5e/v6e (128 MiB),
    # 48 MiB on v7x (64 MiB).
    limit = min((cap * 3) // 4, 96 << 20)
    # Leave headroom for gamma/beta strips, regalloc and compiler scratch.
    budget = max(8 << 20, limit - (8 << 20))
    return limit, budget


def batchnorm_pallas(x, theta_sigma, theta_mu, *,
                     lane_tile=4096, vmem_budget_bytes=None,
                     vmem_limit_bytes=None):
    """x: [N, C]; theta_sigma/theta_mu: [C].  Returns [N, C] (x.dtype)."""
    N, C = x.shape
    if N < 2:
        # torch.var(dim=0) with a single sample divides by zero; disallow here.
        raise ValueError("BatchNorm kernel requires batch size N >= 2")

    auto_limit, auto_budget = _vmem_sizing()
    if vmem_limit_bytes is None:
        vmem_limit_bytes = auto_limit
    if vmem_budget_bytes is None:
        vmem_budget_bytes = min(auto_budget, vmem_limit_bytes)

    itemsize = jnp.dtype(x.dtype).itemsize

    # ---- lane-tile sizing ---------------------------------------------------
    n_blocks = pl.cdiv(C, 128)                      # 128-lane blocks after pad
    # Per-lane-column VMEM cost of one grid step:
    #   double-buffered x-in + out tiles: 4 * N * itemsize
    #   in-kernel f32 temporaries (upcast + centered diff): ~2 * N * 4
    bytes_per_lane = 4 * N * itemsize + 8 * N
    max_tc_blocks = max(1, int(vmem_budget_bytes // (bytes_per_lane * 128)))
    cap_blocks = max(1, lane_tile // 128)
    tc_blocks = min(max_tc_blocks, cap_blocks, n_blocks)
    # Guarantee >= 2 channel strips whenever splittable so "parallel" can
    # shard the grid across both TensorCores on v7x.
    if n_blocks >= 2:
        tc_blocks = max(1, min(tc_blocks, n_blocks // 2))
    grid_c = pl.cdiv(n_blocks, tc_blocks)
    tc_blocks = pl.cdiv(n_blocks, grid_c)           # rebalance -> even strips
    tc = tc_blocks * 128
    C_full = grid_c * tc                            # lane-dense padded width

    # ---- lane-dense padding of inputs --------------------------------------
    pad = C_full - C
    if pad:
        x_in = jnp.pad(x, ((0, 0), (0, pad)))
        gamma = jnp.pad(theta_sigma.astype(jnp.float32), (0, pad),
                        constant_values=1.0).reshape(1, C_full)
        beta = jnp.pad(theta_mu.astype(jnp.float32), (0, pad)).reshape(1, C_full)
    else:
        x_in = x
        gamma = theta_sigma.astype(jnp.float32).reshape(1, C_full)
        beta = theta_mu.astype(jnp.float32).reshape(1, C_full)

    cost = pl.CostEstimate(
        flops=6 * N * C_full,                   # center, square, sum, mul-add
        transcendentals=C_full,                 # rsqrt per channel
        bytes_accessed=2 * N * C_full * itemsize + 2 * C_full * 4,
    )

    out = pl.pallas_call(
        batchnorm_kernel,
        out_shape=jax.ShapeDtypeStruct((N, C_full), x.dtype),
        grid_spec=pltpu.PrefetchScalarGridSpec(
            num_scalar_prefetch=0,
            grid=(grid_c,),
            in_specs=[
                pl.BlockSpec((N, tc), lambda j: (0, j)),   # x channel strip
                pl.BlockSpec((1, tc), lambda j: (0, j)),   # gamma strip
                pl.BlockSpec((1, tc), lambda j: (0, j)),   # beta strip
            ],
            out_specs=pl.BlockSpec((N, tc), lambda j: (0, j)),
        ),
        compiler_params=pltpu.CompilerParams(
            # Channel strips are fully independent -> shard across TCs on v7x.
            dimension_semantics=("parallel",),
            vmem_limit_bytes=vmem_limit_bytes,
        ),
        cost_estimate=cost,
    )(x_in, gamma, beta)

    return out[:, :C] if pad else out


def batchnorm_ref(x, theta_sigma, theta_mu):
    mean = jnp.mean(x, axis=0)
    var = jnp.var(x, axis=0, ddof=1)   # unbiased, matches torch.var default
    y = (x - mean) / jnp.sqrt(var + EPS)
    return theta_sigma * y + theta_mu


if __name__ == "__main__":
    key = jax.random.PRNGKey(0)
    k1, k2, k3, k4 = jax.random.split(key, 4)

    # Case 1: C < 128 (wrapper pads channels to a lane-dense 128-wide strip).
    N1, C1 = 8, 32
    x1 = jax.random.normal(k1, (N1, C1), dtype=jnp.float32) * 2.0 + 0.5
    g1 = jnp.ones((C1,), dtype=jnp.float32)      # theta_sigma as in __init__
    b1 = jnp.zeros((C1,), dtype=jnp.float32)     # theta_mu as in __init__
    out1 = jax.block_until_ready(batchnorm_pallas(x1, g1, b1))
    ref1 = batchnorm_ref(x1, g1, b1)
    assert out1.shape == (N1, C1)
    assert jnp.allclose(out1, ref1, atol=1e-4, rtol=1e-4), "mismatch (case 1)"

    # Case 2: multi-strip channel grid (>= 2 strips -> both v7x TCs busy).
    N2, C2 = 8, 256
    x2 = jax.random.normal(k2, (N2, C2), dtype=jnp.float32) * 1.5 - 0.25
    g2 = jax.random.normal(k3, (C2,), dtype=jnp.float32) * 0.1 + 1.0
    b2 = jax.random.normal(k4, (C2,), dtype=jnp.float32) * 0.05
    out2 = jax.block_until_ready(batchnorm_pallas(x2, g2, b2))
    ref2 = batchnorm_ref(x2, g2, b2)
    assert out2.shape == (N2, C2)
    assert jnp.allclose(out2, ref2, atol=1e-4, rtol=1e-4), "mismatch (case 2)"

    # Case 3: non-128-multiple C (padding + rebalanced even strips).
    N3, C3 = 16, 320
    x3 = jax.random.normal(k2, (N3, C3), dtype=jnp.float32) * 0.7 + 1.0
    g3 = jnp.ones((C3,), dtype=jnp.float32)
    b3 = jnp.zeros((C3,), dtype=jnp.float32)
    out3 = jax.block_until_ready(batchnorm_pallas(x3, g3, b3))
    ref3 = batchnorm_ref(x3, g3, b3)
    assert out3.shape == (N3, C3)
    assert jnp.allclose(out3, ref3, atol=1e-4, rtol=1e-4), "mismatch (case 3)"

    print("KERNEL_OK")
</pallas_src>

<mosaic_0001>
module attributes {stable_mosaic.version = 11 : i64} {
  func.func @batchnorm_kernel(%arg0: i32, %arg1: memref<8x128xf32, #tpu.memory_space<vmem>>, %arg2: memref<1x128xf32, #tpu.memory_space<vmem>>, %arg3: memref<1x128xf32, #tpu.memory_space<vmem>>, %arg4: memref<8x128xf32, #tpu.memory_space<vmem>>) attributes {dimension_semantics = [#tpu.dimension_semantics<parallel>], iteration_bounds = array<i64: 1>, scalar_prefetch = 0 : i64, scratch_operands = 0 : i64, tpu.core_type = #tpu.core_type<tc>, window_params = [{transform_indices = @transform_0, window_bounds = array<i64: 8, 128>}, {transform_indices = @transform_1, window_bounds = array<i64: 1, 128>}, {transform_indices = @transform_2, window_bounds = array<i64: 1, 128>}, {transform_indices = @transform_3, window_bounds = array<i64: 8, 128>}]} {
    %c0 = arith.constant 0 : index
    %c0_0 = arith.constant 0 : index
    %0 = vector.load %arg1[%c0, %c0_0] : memref<8x128xf32, #tpu.memory_space<vmem>>, vector<8x128xf32>
    %cst = arith.constant dense<0.000000e+00> : vector<128xf32>
    %1 = vector.multi_reduction <add>, %0, %cst [0] : vector<8x128xf32> to vector<128xf32>
    %2 = vector.shape_cast %1 : vector<128xf32> to vector<1x128xf32>
    %cst_1 = arith.constant 8.000000e+00 : f32
    %3 = vector.broadcast %cst_1 : f32 to vector<1x128xf32>
    %4 = arith.divf %2, %3 : vector<1x128xf32>
    %5 = vector.broadcast %4 : vector<1x128xf32> to vector<8x128xf32>
    %6 = arith.subf %0, %5 : vector<8x128xf32>
    %7 = arith.mulf %6, %6 : vector<8x128xf32>
    %cst_2 = arith.constant dense<0.000000e+00> : vector<128xf32>
    %8 = vector.multi_reduction <add>, %7, %cst_2 [0] : vector<8x128xf32> to vector<128xf32>
    %9 = vector.shape_cast %8 : vector<128xf32> to vector<1x128xf32>
    %cst_3 = arith.constant 7.000000e+00 : f32
    %10 = vector.broadcast %cst_3 : f32 to vector<1x128xf32>
    %11 = arith.divf %9, %10 : vector<1x128xf32>
    %cst_4 = arith.constant 9.99999997E-7 : f32
    %12 = vector.broadcast %cst_4 : f32 to vector<1x128xf32>
    %13 = arith.addf %11, %12 : vector<1x128xf32>
    %14 = math.rsqrt %13 : vector<1x128xf32>
    %c0_5 = arith.constant 0 : index
    %c0_6 = arith.constant 0 : index
    %15 = vector.load %arg2[%c0_5, %c0_6] : memref<1x128xf32, #tpu.memory_space<vmem>>, vector<1x128xf32>
    %c0_7 = arith.constant 0 : index
    %c0_8 = arith.constant 0 : index
    %16 = vector.load %arg3[%c0_7, %c0_8] : memref<1x128xf32, #tpu.memory_space<vmem>>, vector<1x128xf32>
    %17 = arith.mulf %15, %14 : vector<1x128xf32>
    %18 = arith.mulf %4, %17 : vector<1x128xf32>
    %19 = arith.subf %16, %18 : vector<1x128xf32>
    %20 = vector.broadcast %17 : vector<1x128xf32> to vector<8x128xf32>
    %21 = arith.mulf %0, %20 : vector<8x128xf32>
    %22 = vector.broadcast %19 : vector<1x128xf32> to vector<8x128xf32>
    %23 = arith.addf %21, %22 : vector<8x128xf32>
    %c0_9 = arith.constant 0 : index
    %c0_10 = arith.constant 0 : index
    %24 = vector.load %arg4[%c0_9, %c0_10] : memref<8x128xf32, #tpu.memory_space<vmem>>, vector<8x128xf32>
    tpu.vector_store %arg4[%c0_9, %c0_10], %23 {strides = array<i32>} : memref<8x128xf32, #tpu.memory_space<vmem>>, vector<8x128xf32>,
    return
  }
  func.func @transform_0(%arg0: i32) -> (i32, i32) {
    %c0_i32 = arith.constant 0 : i32
    %c0_i32_0 = arith.constant 0 : i32
    return %c0_i32, %arg0 : i32, i32
  }
  func.func @transform_1(%arg0: i32) -> (i32, i32) {
    %c0_i32 = arith.constant 0 : i32
    %c0_i32_0 = arith.constant 0 : i32
    return %c0_i32, %arg0 : i32, i32
  }
  func.func @transform_2(%arg0: i32) -> (i32, i32) {
    %c0_i32 = arith.constant 0 : i32
    %c0_i32_0 = arith.constant 0 : i32
    return %c0_i32, %arg0 : i32, i32
  }
  func.func @transform_3(%arg0: i32) -> (i32, i32) {
    %c0_i32 = arith.constant 0 : i32
    %c0_i32_0 = arith.constant 0 : i32
    return %c0_i32, %arg0 : i32, i32
  }
}

</mosaic_0001>

<bundles_post_ra>
// kernel: tpu_custom_call.1
= control target key start
LH: loop header
LB: loop body
LE: loop exit
PB: predicated region body
PF: predicated region fallthrough
CT: control target
= control target key end

     0   :  { %8 = vsyncpa [#allocation3], 0  ;;  %s187_s0 = inlined_call_operand.hbm [shape: f32[8,128], index: 0, kind: input, shape index: {}]   ;;  %s188_s1 = inlined_call_operand.vmem [shape: f32[1,128], index: 1, kind: input, shape index: {}]   ;;  %s189_s2 = inlined_call_operand.vmem [shape: f32[1,128], index: 2, kind: input, shape index: {}]   ;;  %s190_s3 = inlined_call_operand.hbm [shape: f32[8,128], index: 3, kind: output, shape index: {}]  }
   0x1   :  { %9 = vsyncpa [#allocation4], 0  ;;  %s135_s12 = smov [#allocation2]   ;;  %s87_s16 = scalar_lea.hbm %s187_s0, 128 }
   0x2   :  { %s16_s13 = sshll.u32 %s135_s12, 4  ;;  %p88_p0 = scmp.ne.s32.totalorder %s187_s0, %s87_s16  ;;  %s17_s13 = int_to_ptr.vmem [resolvable:$true] %s16_s13 }
   0x3   :  { %p91_p1 = scmp.lt.u32.totalorder %s87_s16, %s187_s0 }
   0x5   :  { %p93_p2 = pnand %p91_p1, %p88_p0 }
   0x7   :  { %96 = shalt.err (!%p93_p2)
}
   0x8   :  { %s97_s21 = scalar_lea.vmem %s17_s13, 128  ;;  %p102_p4 = scmp.lt.s32.totalorder %s17_s13, %s17_s13 }
   0x9   :  { %p98_p3 = scmp.ne.s32.totalorder %s17_s13, %s97_s21  ;;  %p103_p5 = scmp.lt.s32.totalorder %s97_s21, %s97_s21 }
   0xb   :  { %p104_p6 = por %p103_p5, %p102_p4 }
   0xd   :  { %p105_p7 = pnand %p104_p6, %p98_p3 }
   0xf   :  { %108 = shalt.err (!%p105_p7)
}
  0x10   :  { %19 = dma.hbm_to_vmem [thread:$0]  %s187_s0, 128, %s17_s13, [#allocation3]  }
  0x11   :  { %131 = dma.done.wait [#allocation3], 128  }
  0x12   :  { %132 = vsyncadd [#allocation3], 4294967168  ;;  %v27_v0 = vld [vmem:[#allocation2] sm:$0xff]  ;;  %v54_v18 = vlaneseq  ;;  %s136_s27 = smov [#allocation5]  }
  0x13   :  { %v28_v1 = vrot.slane %v27_v0, 4  ;;  %v48_v20 = vld [vmem:[%s188_s1] sm:$0x1]  ;;  %s74_s28 = sshll.u32 %s136_s27, 4  ;;  %s75_s28 = int_to_ptr.vmem [resolvable:$true] %s74_s28 }
  0x14   :  { %v55_v19 = vshrl.u32 %v54_v18, 7  ;;  %v49_v24 = vld [vmem:[%s189_s2] sm:$0x1]  ;;  %s109_s29 = scalar_lea.vmem %s75_s28, 128  ;;  %p114_p9 = scmp.lt.s32.totalorder %s75_s28, %s75_s28 }
  0x15   :  { %v29_v2 = vadd.f32 %v28_v1, %v27_v0  ;;  %p110_p8 = scmp.ne.s32.totalorder %s75_s28, %s109_s29  ;;  %p115_p10 = scmp.lt.s32.totalorder %s109_s29, %s109_s29 }
  0x16   :  { %v56_v21 = vsub.s32 0, %v55_v19 }
  0x17   :  { %v30_v3 = vrot.slane %v29_v2, 2  ;;  %p116_p11 = por %p115_p10, %p114_p9 }
  0x19   :  { %v31_v4 = vadd.f32 %v30_v3, %v29_v2  ;;  %p117_p12 = pnand %p116_p11, %p110_p8 }
  0x1b   :  { %v32_v5 = vrot.slane %v31_v4, 1 }
  0x1d   :  { %v33_v6 = vadd.f32 %v32_v5, %v31_v4 }
  0x1f   :  { %v35_v7 = vmul.f32 0.125, %v33_v6 }
  0x21   :  { %v36_v8 = vsub.f32 %v27_v0, %v35_v7 }
  0x23   :  { %v37_v9 = vmul.f32 %v36_v8, %v36_v8 }
  0x25   :  { %v38_v10 = vrot.slane %v37_v9, 4 }
  0x27   :  { %v39_v11 = vadd.f32 %v38_v10, %v37_v9 }
  0x29   :  { %v40_v12 = vrot.slane %v39_v11, 2 }
  0x2b   :  { %v41_v13 = vadd.f32 %v40_v12, %v39_v11 }
  0x2d   :  { %v42_v14 = vrot.slane %v41_v13, 1 }
  0x2f   :  { %v43_v15 = vadd.f32 %v42_v14, %v41_v13 }
  0x31   :  { %v45_v16 = vmul.f32 0.14285715, %v43_v15 }
  0x33   :  { %v46_v17 = vadd.f32 1e-06, %v45_v16 }
  0x35   :  { %85 = vrsqrt.f32 %v46_v17 }
  0x3f   :  { %v86_v22 = vpop.eup %85 }
  0x40   :  { %v50_v23 = vmul.f32 %v86_v22, %v48_v20 }
  0x42   :  { %v51_v25 = vmul.f32 %v50_v23, %v35_v7  ;;  %v57_v26 = vrot.slane %v50_v23, %v56_v21 }
  0x44   :  { %v52_v27 = vsub.f32 %v49_v24, %v51_v25  ;;  %v59_v28 = vmul.f32 %v57_v26, %v27_v0 }
  0x46   :  { %v64_v29 = vrot.slane %v52_v27, %v56_v21 }
  0x48   :  { %v66_v30 = vadd.f32 %v64_v29, %v59_v28 }
  0x4a   :  { %67 = vst [vmem:[#allocation5] sm:$0xff] %v66_v30 }
  0x4b   :  { %120 = shalt.err (!%p117_p12)
}
  0x4c   :  { %s121_s2 = scalar_lea.hbm %s190_s3, 128 }
  0x4d   :  { %p122_p13 = scmp.ne.s32.totalorder %s190_s3, %s121_s2  ;;  %p125_p0 = scmp.lt.u32.totalorder %s121_s2, %s190_s3 }
  0x4f   :  { %p127_p1 = pnand %p125_p0, %p122_p13 }
  0x51   :  { %130 = shalt.err (!%p127_p1)
}
  0x52   :  { %77 = dma.vmem_to_hbm [thread:$0]  %s75_s28, 128, %s190_s3, [#allocation4]  }
  0x53   :  { %133 = dma.done.wait [#allocation4], 128  }
  0x54   :  { %134 = vsyncadd [#allocation4], 4294967168 }
  0x55   :  { %81 = vsyncpa [#allocation3], 1 }
  0x56   :  { %82 = vsyncpa [#allocation4], 1 }

</bundles_post_ra>
